<compile_context>
chip_gen: v7x
topology: tpu7x:2x2x1
jax: 0.10.0
libtpu: 0.0.40
codegen_flags: <defaults>
</compile_context>

<pallas_src>
import functools

import jax
import jax.numpy as jnp
from jax import lax
from jax.experimental import pallas as pl
from jax.experimental.pallas import tpu as pltpu


def _dw_conv3x3_sig_kernel(x_ref, w_ref, b_ref, o_ref, *, H, W):
    """Depthwise 3x3 conv (stride 1, pad 1) + sigmoid on a packed (rows, H*W) tile.

    x_ref:  (R, H*W)  rows = packed (batch, channel), lanes = flattened H*W
    w_ref:  (R, 9)    per-row taps, column index = kh*3 + kw
    b_ref:  (R, 1)    per-row bias
    o_ref:  (R, H*W)  lane-dense output
    """
    R, HW = x_ref.shape

    # Hoisted loads: one read each, sliced in registers inside the tap loop.
    x = x_ref[...].astype(jnp.float32)
    w = w_ref[...].astype(jnp.float32)
    b = b_ref[...].astype(jnp.float32)

    # Lane-position masks (built once).  A +-1 shift along W must not bleed across a row
    # boundary, and +-W shifts must not wrap top<->bottom through the circular roll.
    flat = lax.broadcasted_iota(jnp.int32, (R, HW), 1)
    if (W & (W - 1)) == 0:
        col = flat & (W - 1)          # W power of two: single VPU op instead of rem
    else:
        col = lax.rem(flat, W)
    not_left = col > 0                # valid when reading the w-1 neighbor
    not_right = col < (W - 1)         # valid when reading the w+1 neighbor
    not_top = flat >= W               # valid when reading the h-1 neighbor
    not_bottom = flat < (H - 1) * W   # valid when reading the h+1 neighbor

    acc = jnp.zeros((R, HW), jnp.float32)
    for kh in range(3):
        for kw in range(3):
            s = (kh - 1) * W + (kw - 1)          # flat offset of this tap
            if s == 0:
                tap = x
            else:
                # tap[p] = x[p + s]; circular wrap is fully removed by the masks below.
                tap = pltpu.roll(x, (-s) % HW, axis=1)   # XLU lane rotate, static shift
            mask = None
            if kh == 0:
                mask = not_top
            elif kh == 2:
                mask = not_bottom
            if kw == 0:
                mask = not_left if mask is None else jnp.logical_and(mask, not_left)
            elif kw == 2:
                mask = not_right if mask is None else jnp.logical_and(mask, not_right)
            if mask is not None:
                tap = jnp.where(mask, tap, 0.0)
            coef = w[:, kh * 3 + kw:kh * 3 + kw + 1]     # (R, 1) register slice
            acc = acc + coef * tap                       # VPU multiply-add, no MXU

    acc = acc + b
    # Exact sigmoid: one EUP tanh push; matches the jax.nn.sigmoid reference to ~1e-6.
    out = 0.5 * jnp.tanh(0.5 * acc) + 0.5
    o_ref[...] = out.astype(o_ref.dtype)


def gbasic_block_sig(x, weight, bias, groups=4, ksize=3, stride=1, pad=1):
    """GBasicBlockSig forward: Conv2d(k=3, s=1, p=1, groups) + Sigmoid.

    x: (N, Cin, H, W); weight: (Cout, Cin//groups, 3, 3); bias: (Cout,).
    Implemented for the depthwise case Cin == Cout == groups (the module's
    in_channels=out_channels=4, groups=4 configuration).
    """
    N, Cin, H, W = x.shape
    Cout = weight.shape[0]
    assert ksize == 3 and stride == 1 and pad == 1, "module defaults only"
    assert Cin == Cout == groups and weight.shape[1] == 1, (
        "depthwise formulation requires Cin == Cout == groups")

    HW = H * W
    NC = N * Cin

    # Rows per grid step: pack the whole batch into one step when it comfortably fits
    # VMEM (fills the 8 f32 sublanes and removes per-step overhead); for big inputs
    # split along N so each step still carries whole images.
    budget = 4 << 20                                   # per-operand block budget (bytes)
    bn = 1
    for cand in range(N, 0, -1):
        if N % cand == 0 and cand * Cin * HW * x.dtype.itemsize <= budget:
            bn = cand
            break
    grid_steps = N // bn
    R = bn * Cin                                        # rows per grid step

    # Pure views: NCHW is already contiguous as (N*C, H*W).  Weight/bias are tiled so
    # row b*C + c of a block uses the taps of channel c.
    x2 = x.reshape(NC, HW)
    w9 = jnp.tile(weight.reshape(Cout, 9), (bn, 1))     # (R, 9), identical every step
    b2 = jnp.tile(bias.reshape(Cout, 1), (bn, 1))       # (R, 1)

    out2 = pl.pallas_call(
        functools.partial(_dw_conv3x3_sig_kernel, H=H, W=W),
        out_shape=jax.ShapeDtypeStruct((NC, HW), x.dtype),
        grid_spec=pltpu.PrefetchScalarGridSpec(
            num_scalar_prefetch=0,
            grid=(grid_steps,),                         # 1 step at this problem size
            in_specs=[
                pl.BlockSpec((R, HW), lambda i: (i, 0)),
                pl.BlockSpec((R, 9), lambda i: (0, 0)),
                pl.BlockSpec((R, 1), lambda i: (0, 0)),
            ],
            out_specs=pl.BlockSpec((R, HW), lambda i: (i, 0)),
        ),
        compiler_params=pltpu.CompilerParams(dimension_semantics=("parallel",)),
    )(x2, w9, b2)

    return out2.reshape(N, Cout, H, W)


if __name__ == "__main__":
    # Module config: in_channels=4, out_channels=4, ksize=3, stride=1, pad=1, groups=4
    N, C, H, W = 2, 4, 16, 16
    groups, ksize = 4, 3

    key = jax.random.PRNGKey(0)
    kx, kw, kb = jax.random.split(key, 3)
    x = jax.random.normal(kx, (N, C, H, W), dtype=jnp.float32)
    weight = jax.random.normal(kw, (C, C // groups, ksize, ksize),
                               dtype=jnp.float32) * 0.1
    bias = jax.random.normal(kb, (C,), dtype=jnp.float32) * 0.1

    out = gbasic_block_sig(x, weight, bias, groups=groups, ksize=ksize)
    out = jax.block_until_ready(out)

    # Reference: grouped conv + sigmoid in plain JAX.
    ref = lax.conv_general_dilated(
        x, weight, window_strides=(1, 1), padding=((1, 1), (1, 1)),
        dimension_numbers=("NCHW", "OIHW", "NCHW"), feature_group_count=groups)
    ref = jax.nn.sigmoid(ref + bias.reshape(1, -1, 1, 1))

    assert out.shape == (N, C, H, W)
    err = float(jnp.max(jnp.abs(out - ref)))
    assert err < 2e-3, f"mismatch vs reference: max abs err {err}"
    print("KERNEL_OK")
</pallas_src>

<mosaic_0001>
module attributes {stable_mosaic.version = 11 : i64} {
  func.func @_dw_conv3x3_sig_kernel(%arg0: i32, %arg1: memref<8x256xf32, #tpu.memory_space<vmem>>, %arg2: memref<8x9xf32, #tpu.memory_space<vmem>>, %arg3: memref<8x1xf32, #tpu.memory_space<vmem>>, %arg4: memref<8x256xf32, #tpu.memory_space<vmem>>) attributes {dimension_semantics = [#tpu.dimension_semantics<parallel>], iteration_bounds = array<i64: 1>, scalar_prefetch = 0 : i64, scratch_operands = 0 : i64, tpu.core_type = #tpu.core_type<tc>, window_params = [{transform_indices = @transform_0, window_bounds = array<i64: 8, 256>}, {pipeline_mode = #tpu.pipeline_mode<synchronous>, transform_indices = @transform_1, window_bounds = array<i64: 8, 9>}, {pipeline_mode = #tpu.pipeline_mode<synchronous>, transform_indices = @transform_2, window_bounds = array<i64: 8, 1>}, {transform_indices = @transform_3, window_bounds = array<i64: 8, 256>}]} {
    %c0 = arith.constant 0 : index
    %c0_0 = arith.constant 0 : index
    %0 = vector.load %arg1[%c0, %c0_0] : memref<8x256xf32, #tpu.memory_space<vmem>>, vector<8x256xf32>
    %c0_1 = arith.constant 0 : index
    %c0_2 = arith.constant 0 : index
    %1 = vector.load %arg2[%c0_1, %c0_2] : memref<8x9xf32, #tpu.memory_space<vmem>>, vector<8x9xf32>
    %c0_3 = arith.constant 0 : index
    %c0_4 = arith.constant 0 : index
    %2 = vector.load %arg3[%c0_3, %c0_4] : memref<8x1xf32, #tpu.memory_space<vmem>>, vector<8x1xf32>
    %3 = tpu.iota {dimensions = array<i32: 1>} : vector<8x256xi32>
    %c15_i32 = arith.constant 15 : i32
    %4 = vector.broadcast %c15_i32 : i32 to vector<8x256xi32>
    %5 = arith.andi %3, %4 : vector<8x256xi32>
    %c0_i32 = arith.constant 0 : i32
    %6 = vector.broadcast %c0_i32 : i32 to vector<8x256xi32>
    %7 = arith.cmpi sgt, %5, %6 : vector<8x256xi32>
    %c15_i32_5 = arith.constant 15 : i32
    %8 = vector.broadcast %c15_i32_5 : i32 to vector<8x256xi32>
    %9 = arith.cmpi slt, %5, %8 : vector<8x256xi32>
    %c16_i32 = arith.constant 16 : i32
    %10 = vector.broadcast %c16_i32 : i32 to vector<8x256xi32>
    %11 = arith.cmpi sge, %3, %10 : vector<8x256xi32>
    %c240_i32 = arith.constant 240 : i32
    %12 = vector.broadcast %c240_i32 : i32 to vector<8x256xi32>
    %13 = arith.cmpi slt, %3, %12 : vector<8x256xi32>
    %cst = arith.constant 0.000000e+00 : f32
    %14 = vector.broadcast %cst : f32 to vector<8x256xf32>
    %c17_i32 = arith.constant 17 : i32
    %15 = tpu.dynamic_rotate %0 by %c17_i32 dim 1 : vector<8x256xf32>, i32 -> vector<8x256xf32>
    %16 = arith.andi %11, %7 : vector<8x256xi1>
    %cst_6 = arith.constant 0.000000e+00 : f32
    %17 = vector.broadcast %cst_6 : f32 to vector<8x256xf32>
    %18 = arith.select %16, %15, %17 : vector<8x256xi1>, vector<8x256xf32>
    %19 = vector.extract_strided_slice %1 {offsets = [0, 0], sizes = [8, 1], strides = [1, 1]} : vector<8x9xf32> to vector<8x1xf32>
    %20 = vector.broadcast %19 : vector<8x1xf32> to vector<8x256xf32>
    %21 = arith.mulf %20, %18 : vector<8x256xf32>
    %22 = arith.addf %14, %21 : vector<8x256xf32>
    %c16_i32_7 = arith.constant 16 : i32
    %23 = tpu.dynamic_rotate %0 by %c16_i32_7 dim 1 : vector<8x256xf32>, i32 -> vector<8x256xf32>
    %cst_8 = arith.constant 0.000000e+00 : f32
    %24 = vector.broadcast %cst_8 : f32 to vector<8x256xf32>
    %25 = arith.select %11, %23, %24 : vector<8x256xi1>, vector<8x256xf32>
    %26 = vector.extract_strided_slice %1 {offsets = [0, 1], sizes = [8, 1], strides = [1, 1]} : vector<8x9xf32> to vector<8x1xf32>
    %27 = vector.broadcast %26 : vector<8x1xf32> to vector<8x256xf32>
    %28 = arith.mulf %27, %25 : vector<8x256xf32>
    %29 = arith.addf %22, %28 : vector<8x256xf32>
    %c15_i32_9 = arith.constant 15 : i32
    %30 = tpu.dynamic_rotate %0 by %c15_i32_9 dim 1 : vector<8x256xf32>, i32 -> vector<8x256xf32>
    %31 = arith.andi %11, %9 : vector<8x256xi1>
    %cst_10 = arith.constant 0.000000e+00 : f32
    %32 = vector.broadcast %cst_10 : f32 to vector<8x256xf32>
    %33 = arith.select %31, %30, %32 : vector<8x256xi1>, vector<8x256xf32>
    %34 = vector.extract_strided_slice %1 {offsets = [0, 2], sizes = [8, 1], strides = [1, 1]} : vector<8x9xf32> to vector<8x1xf32>
    %35 = vector.broadcast %34 : vector<8x1xf32> to vector<8x256xf32>
    %36 = arith.mulf %35, %33 : vector<8x256xf32>
    %37 = arith.addf %29, %36 : vector<8x256xf32>
    %c1_i32 = arith.constant 1 : i32
    %38 = tpu.dynamic_rotate %0 by %c1_i32 dim 1 : vector<8x256xf32>, i32 -> vector<8x256xf32>
    %cst_11 = arith.constant 0.000000e+00 : f32
    %39 = vector.broadcast %cst_11 : f32 to vector<8x256xf32>
    %40 = arith.select %7, %38, %39 : vector<8x256xi1>, vector<8x256xf32>
    %41 = vector.extract_strided_slice %1 {offsets = [0, 3], sizes = [8, 1], strides = [1, 1]} : vector<8x9xf32> to vector<8x1xf32>
    %42 = vector.broadcast %41 : vector<8x1xf32> to vector<8x256xf32>
    %43 = arith.mulf %42, %40 : vector<8x256xf32>
    %44 = arith.addf %37, %43 : vector<8x256xf32>
    %45 = vector.extract_strided_slice %1 {offsets = [0, 4], sizes = [8, 1], strides = [1, 1]} : vector<8x9xf32> to vector<8x1xf32>
    %46 = vector.broadcast %45 : vector<8x1xf32> to vector<8x256xf32>
    %47 = arith.mulf %46, %0 : vector<8x256xf32>
    %48 = arith.addf %44, %47 : vector<8x256xf32>
    %c255_i32 = arith.constant 255 : i32
    %49 = tpu.dynamic_rotate %0 by %c255_i32 dim 1 : vector<8x256xf32>, i32 -> vector<8x256xf32>
    %cst_12 = arith.constant 0.000000e+00 : f32
    %50 = vector.broadcast %cst_12 : f32 to vector<8x256xf32>
    %51 = arith.select %9, %49, %50 : vector<8x256xi1>, vector<8x256xf32>
    %52 = vector.extract_strided_slice %1 {offsets = [0, 5], sizes = [8, 1], strides = [1, 1]} : vector<8x9xf32> to vector<8x1xf32>
    %53 = vector.broadcast %52 : vector<8x1xf32> to vector<8x256xf32>
    %54 = arith.mulf %53, %51 : vector<8x256xf32>
    %55 = arith.addf %48, %54 : vector<8x256xf32>
    %c241_i32 = arith.constant 241 : i32
    %56 = tpu.dynamic_rotate %0 by %c241_i32 dim 1 : vector<8x256xf32>, i32 -> vector<8x256xf32>
    %57 = arith.andi %13, %7 : vector<8x256xi1>
    %cst_13 = arith.constant 0.000000e+00 : f32
    %58 = vector.broadcast %cst_13 : f32 to vector<8x256xf32>
    %59 = arith.select %57, %56, %58 : vector<8x256xi1>, vector<8x256xf32>
    %60 = vector.extract_strided_slice %1 {offsets = [0, 6], sizes = [8, 1], strides = [1, 1]} : vector<8x9xf32> to vector<8x1xf32>
    %61 = vector.broadcast %60 : vector<8x1xf32> to vector<8x256xf32>
    %62 = arith.mulf %61, %59 : vector<8x256xf32>
    %63 = arith.addf %55, %62 : vector<8x256xf32>
    %c240_i32_14 = arith.constant 240 : i32
    %64 = tpu.dynamic_rotate %0 by %c240_i32_14 dim 1 : vector<8x256xf32>, i32 -> vector<8x256xf32>
    %cst_15 = arith.constant 0.000000e+00 : f32
    %65 = vector.broadcast %cst_15 : f32 to vector<8x256xf32>
    %66 = arith.select %13, %64, %65 : vector<8x256xi1>, vector<8x256xf32>
    %67 = vector.extract_strided_slice %1 {offsets = [0, 7], sizes = [8, 1], strides = [1, 1]} : vector<8x9xf32> to vector<8x1xf32>
    %68 = vector.broadcast %67 : vector<8x1xf32> to vector<8x256xf32>
    %69 = arith.mulf %68, %66 : vector<8x256xf32>
    %70 = arith.addf %63, %69 : vector<8x256xf32>
    %c239_i32 = arith.constant 239 : i32
    %71 = tpu.dynamic_rotate %0 by %c239_i32 dim 1 : vector<8x256xf32>, i32 -> vector<8x256xf32>
    %72 = arith.andi %13, %9 : vector<8x256xi1>
    %cst_16 = arith.constant 0.000000e+00 : f32
    %73 = vector.broadcast %cst_16 : f32 to vector<8x256xf32>
    %74 = arith.select %72, %71, %73 : vector<8x256xi1>, vector<8x256xf32>
    %75 = vector.extract_strided_slice %1 {offsets = [0, 8], sizes = [8, 1], strides = [1, 1]} : vector<8x9xf32> to vector<8x1xf32>
    %76 = vector.broadcast %75 : vector<8x1xf32> to vector<8x256xf32>
    %77 = arith.mulf %76, %74 : vector<8x256xf32>
    %78 = arith.addf %70, %77 : vector<8x256xf32>
    %79 = vector.broadcast %2 : vector<8x1xf32> to vector<8x256xf32>
    %80 = arith.addf %78, %79 : vector<8x256xf32>
    %cst_17 = arith.constant 5.000000e-01 : f32
    %81 = vector.broadcast %cst_17 : f32 to vector<8x256xf32>
    %82 = arith.mulf %81, %80 : vector<8x256xf32>
    %83 = math.tanh %82 : vector<8x256xf32>
    %cst_18 = arith.constant 5.000000e-01 : f32
    %84 = vector.broadcast %cst_18 : f32 to vector<8x256xf32>
    %85 = arith.mulf %84, %83 : vector<8x256xf32>
    %cst_19 = arith.constant 5.000000e-01 : f32
    %86 = vector.broadcast %cst_19 : f32 to vector<8x256xf32>
    %87 = arith.addf %85, %86 : vector<8x256xf32>
    %c0_20 = arith.constant 0 : index
    %c0_21 = arith.constant 0 : index
    %88 = vector.load %arg4[%c0_20, %c0_21] : memref<8x256xf32, #tpu.memory_space<vmem>>, vector<8x256xf32>
    tpu.vector_store %arg4[%c0_20, %c0_21], %87 {strides = array<i32>} : memref<8x256xf32, #tpu.memory_space<vmem>>, vector<8x256xf32>,
    return
  }
  func.func @transform_0(%arg0: i32) -> (i32, i32) {
    %c0_i32 = arith.constant 0 : i32
    %c0_i32_0 = arith.constant 0 : i32
    return %arg0, %c0_i32 : i32, i32
  }
  func.func @transform_1(%arg0: i32) -> (i32, i32) {
    %c0_i32 = arith.constant 0 : i32
    %c0_i32_0 = arith.constant 0 : i32
    %c0_i32_1 = arith.constant 0 : i32
    return %c0_i32, %c0_i32_0 : i32, i32
  }
  func.func @transform_2(%arg0: i32) -> (i32, i32) {
    %c0_i32 = arith.constant 0 : i32
    %c0_i32_0 = arith.constant 0 : i32
    %c0_i32_1 = arith.constant 0 : i32
    return %c0_i32, %c0_i32_0 : i32, i32
  }
  func.func @transform_3(%arg0: i32) -> (i32, i32) {
    %c0_i32 = arith.constant 0 : i32
    %c0_i32_0 = arith.constant 0 : i32
    return %arg0, %c0_i32 : i32, i32
  }
}

</mosaic_0001>

<bundles_post_ra>
// kernel: tpu_custom_call.1
= control target key start
LH: loop header
LB: loop body
LE: loop exit
PB: predicated region body
PF: predicated region fallthrough
CT: control target
= control target key end

     0   :  { %8 = vsyncpa [#allocation3], 0  ;;  %s522_s0 = inlined_call_operand.hbm [shape: f32[8,256], index: 0, kind: input, shape index: {}]   ;;  %s523_s1 = inlined_call_operand.vmem [shape: f32[8,9], index: 1, kind: input, shape index: {}]   ;;  %s524_s2 = inlined_call_operand.vmem [shape: f32[8,1], index: 2, kind: input, shape index: {}]   ;;  %s525_s3 = inlined_call_operand.hbm [shape: f32[8,256], index: 3, kind: output, shape index: {}]  }
   0x1   :  { %9 = vsyncpa [#allocation4], 0  ;;  %s310_s12 = smov [#allocation2]   ;;  %s262_s16 = scalar_lea.hbm %s522_s0, 256 }
   0x2   :  { %s16_s13 = sshll.u32 %s310_s12, 4  ;;  %p263_p0 = scmp.ne.s32.totalorder %s522_s0, %s262_s16  ;;  %s17_s13 = int_to_ptr.vmem [resolvable:$true] %s16_s13 }
   0x3   :  { %p266_p1 = scmp.lt.u32.totalorder %s262_s16, %s522_s0 }
   0x5   :  { %p268_p2 = pnand %p266_p1, %p263_p0 }
   0x7   :  { %271 = shalt.err (!%p268_p2)
}
   0x8   :  { %s272_s21 = scalar_lea.vmem %s17_s13, 256  ;;  %p277_p4 = scmp.lt.s32.totalorder %s17_s13, %s17_s13 }
   0x9   :  { %p273_p3 = scmp.ne.s32.totalorder %s17_s13, %s272_s21  ;;  %p278_p5 = scmp.lt.s32.totalorder %s272_s21, %s272_s21 }
   0xb   :  { %p279_p6 = por %p278_p5, %p277_p4 }
   0xd   :  { %p280_p7 = pnand %p279_p6, %p273_p3 }
   0xf   :  { %283 = shalt.err (!%p280_p7)
}
  0x10   :  { %19 = dma.hbm_to_vmem [thread:$0]  %s522_s0, 256, %s17_s13, [#allocation3]  }
  0x11   :  { %306 = dma.done.wait [#allocation3], 256  }
  0x12   :  { %307 = vsyncadd [#allocation3], 4294967040  ;;  %v311_v0 = vmov 2   ;;  %v312_v1 = vmov 0   ;;  %v29_v2 = vld [vmem:[%s523_s1] sm:$0xff]  ;;  %v313_v3 = vmov 3   ;;  %v31_v22 = vlaneseq }
  0x13   :  { %250 = vset.pattern.permute.xlu1 %v311_v0  ;;  %248 = vset.pattern.permute.xlu0 %v312_v1  ;;  %v314_v4 = vmov 1   ;;  %v364_v5 = vld [vmem:[#allocation2] sm:$0xff]  ;;  %v366_v6 = vld [vmem:[#allocation2 + $0x8] sm:$0xff]  ;;  %s315_s0 = smov 17   ;;  %v316_v7 = vmov 4   ;;  %v317_v8 = vmov 5  }
  0x14   :  { %93 = vperm.xlu1 %250, %v29_v2   ;;  %57 = vperm.xlu0 %248, %v29_v2   ;;  %s318_s1 = smov 16   ;;  %s319_s26 = smov 15   ;;  %v320_v9 = vmov 7   ;;  %v322_v10 = vmov 6   ;;  %v325_v11 = vmov 8   ;;  %v30_v12 = vld [vmem:[%s524_s2] sm:$0xff] }
  0x15   :  { %s321_s27 = smov 1   ;;  %s323_s28 = smov 127   ;;  %v391_v25 = vand.u32 127, %v31_v22 }
  0x16   :  { %s324_s29 = smov 113   ;;  %s326_s30 = smov 112  }
  0x17   :  { %s327_s6 = smov 111   ;;  %v34_v28 = vand.u32 15, %v391_v25  ;;  %v397_v29 = vadd.s32 128, %v391_v25  ;;  %vm68_vm0 = vcmp.lt.s32.totalorder %v391_v25, 16  ;;  %vm40_vm2 = vcmp.ge.s32.totalorder %v391_v25, 16  ;;  %s328_s2 = smov [#allocation5]  }
  0x18   :  { %251 = vset.pattern.permute.xlu1 %v313_v3  ;;  %249 = vset.pattern.permute.xlu0 %v314_v4  ;;  %vm48_vm3 = vcmp.lt.s32.totalorder %v391_v25, 17  ;;  %vm85_vm5 = vcmp.lt.s32.totalorder %v391_v25, 15  ;;  %vm104_vm7 = vcmp.lt.s32.totalorder %v391_v25, 1  ;;  %vm129_vm11 = vcmp.lt.s32.totalorder %v391_v25, 127  ;;  %s220_s7 = sshll.u32 %s328_s2, 4  ;;  %s221_s7 = int_to_ptr.vmem [resolvable:$true] %s220_s7 }
  0x19   :  { %110 = vperm.xlu1 %251, %v29_v2   ;;  %74 = vperm.xlu0 %249, %v29_v2   ;;  %vm402_vm1 = vcmp.gt.s32.totalorder %v34_v28, 0  ;;  %v35_v33 = vand.u32 15, %v397_v29  ;;  %vm409_vm4 = vcmp.lt.s32.totalorder %v34_v28, 15  ;;  %vm146_vm12 = vcmp.lt.s32.totalorder %v391_v25, 113  ;;  %s284_s8 = scalar_lea.vmem %s221_s7, 256  ;;  %p289_p9 = scmp.lt.s32.totalorder %s221_s7, %s221_s7 }
  0x1a   :  { %vm420_vm6 = vmand %vm40_vm2, %vm402_vm1  ;;  %vm43_vm13 = vcmp.lt.s32.totalorder %v397_v29, 240  ;;  %vm165_vm14 = vcmp.lt.s32.totalorder %v391_v25, 112  ;;  %p285_p8 = scmp.ne.s32.totalorder %s221_s7, %s284_s8  ;;  %p290_p10 = scmp.lt.s32.totalorder %s284_s8, %s284_s8 }
  0x1b   :  { %vm427_vm8 = vmand %vm40_vm2, %vm409_vm4  ;;  %vm431_vm9 = vcmp.gt.s32.totalorder %v35_v33, 0  ;;  %vm437_vm10 = vcmp.lt.s32.totalorder %v35_v33, 15 }
  0x1c   :  { %vm475_vm15 = vmand %vm43_vm13, %vm431_vm9  ;;  %p291_p11 = por %p290_p10, %p289_p9 }
  0x1d   :  { %44 = vrot.lane.b32.xlu1 %v364_v5, %s315_s0  ;;  %46 = vrot.lane.b32.xlu0 %v366_v6, %s315_s0 }
  0x1e   :  { %252 = vset.pattern.permute.xlu1 %v316_v7  ;;  %253 = vset.pattern.permute.xlu0 %v317_v8  ;;  %p292_p12 = pnand %p291_p11, %p285_p8 }
  0x21   :  { %64 = vrot.lane.b32.xlu1 %v364_v5, %s318_s1  ;;  %66 = vrot.lane.b32.xlu0 %v366_v6, %s318_s1 }
  0x25   :  { %118 = vperm.xlu1 %252, %v29_v2   ;;  %81 = vrot.lane.b32.xlu0 %v364_v5, %s319_s26 }
  0x29   :  { %83 = vrot.lane.b32.xlu1 %v366_v6, %s319_s26  ;;  %135 = vperm.xlu0 %253, %v29_v2  }
  0x2a   :  { %255 = vset.pattern.permute.xlu1 %v320_v9 }
  0x2d   :  { %100 = vrot.lane.b32.xlu1 %v364_v5, %s321_s27  ;;  %254 = vset.pattern.permute.xlu0 %v322_v10 }
  0x2e   :  { %154 = vperm.xlu0 %254, %v29_v2  }
  0x31   :  { %102 = vrot.lane.b32.xlu1 %v366_v6, %s321_s27 }
  0x32   :  { %127 = vrot.lane.b32.xlu0 %v366_v6, %s323_s28 }
  0x33   :  { %257 = vset.pattern.permute.xlu0 %v312_v1 }
  0x35   :  { %171 = vperm.xlu1 %255, %v29_v2  }
  0x36   :  { %142 = vrot.lane.b32.xlu0 %v364_v5, %s324_s29 }
  0x39   :  { %125 = vrot.lane.b32.xlu1 %v364_v5, %s323_s28 }
  0x3a   :  { %256 = vset.pattern.permute.xlu1 %v325_v11  ;;  %161 = vrot.lane.b32.xlu0 %v364_v5, %s326_s30 }
  0x3d   :  { %190 = vperm.xlu1 %256, %v29_v2  }
  0x3e   :  { %199 = vperm.xlu0 %257, %v30_v12  }
  0x41   :  { %144 = vrot.lane.b32.xlu1 %v366_v6, %s324_s29 }
  0x45   :  { %163 = vrot.lane.b32.xlu1 %v366_v6, %s326_s30 }
  0x49   :  { %178 = vrot.lane.b32.xlu1 %v364_v5, %s327_s6 }
  0x4d   :  { %180 = vrot.lane.b32.xlu1 %v366_v6, %s327_s6 }
  0x93   :  { %v94_v13 = vpop.permute.xlu1 %93  ;;  %v58_v14 = vpop.permute.xlu0 %57 }
  0x98   :  { %v387_v15 = vpop.permute.xlu1 %110  ;;  %v75_v16 = vpop.permute.xlu0 %74 }
  0x9c   :  { %v45_v17 = vpop.permute.xlu1 %44  ;;  %v47_v18 = vpop.permute.xlu0 %46 }
  0x9d   :  { %v50_v38 = vsel %vm48_vm3, %v47_v18, %v45_v17  ;;  %v49_v42 = vsel %vm48_vm3, %v45_v17, %v47_v18 }
  0x9e   :  { %v53_v50 = vsel %vm420_vm6, %v50_v38, 0.0  ;;  %v54_v52 = vsel %vm431_vm9, %v49_v42, 0.0 }
  0x9f   :  { %v60_v59 = vmul.f32 %v58_v14, %v53_v50  ;;  %v61_v61 = vmul.f32 %v58_v14, %v54_v52 }
  0xa0   :  { %v65_v19 = vpop.permute.xlu1 %64  ;;  %v67_v20 = vpop.permute.xlu0 %66 }
  0xa1   :  { %v70_v36 = vsel %vm68_vm0, %v67_v20, %v65_v19  ;;  %v69_v46 = vsel %vm68_vm0, %v65_v19, %v67_v20  ;;  %vm182_vm0 = vcmp.lt.s32.totalorder %v391_v25, 111 }
  0xa2   :  { %v71_v43 = vsel %vm40_vm2, %v70_v36, 0.0  ;;  %v78_v55 = vmul.f32 %v75_v16, %v69_v46 }
  0xa3   :  { %v77_v53 = vmul.f32 %v75_v16, %v71_v43 }
  0xa4   :  { %v389_v21 = vpop.permute.xlu1 %118  ;;  %v82_v23 = vpop.permute.xlu0 %81  ;;  %v80_v4 = vadd.f32 %v78_v55, %v61_v61 }
  0xa5   :  { %v79_v0 = vadd.f32 %v77_v53, %v60_v59  ;;  %v121_v22 = vmul.f32 %v389_v21, %v364_v5 }
  0xa8   :  { %v84_v24 = vpop.permute.xlu1 %83  ;;  %v393_v27 = vpop.permute.xlu0 %135 }
  0xa9   :  { %v87_v40 = vsel %vm85_vm5, %v84_v24, %v82_v23  ;;  %v86_v48 = vsel %vm85_vm5, %v82_v23, %v84_v24 }
  0xaa   :  { %v90_v51 = vsel %vm427_vm8, %v87_v40, 0.0  ;;  %v91_v56 = vsel %vm437_vm10, %v86_v48, 0.0 }
  0xab   :  { %v96_v60 = vmul.f32 %v94_v13, %v90_v51  ;;  %v97_v1 = vmul.f32 %v94_v13, %v91_v56 }
  0xac   :  { %v101_v26 = vpop.permute.xlu1 %100 }
  0xad   :  { %v400_v31 = vpop.permute.xlu0 %154  ;;  %v98_v8 = vadd.f32 %v96_v60, %v79_v0  ;;  %v99_v13 = vadd.f32 %v97_v1, %v80_v4 }
  0xb0   :  { %v103_v30 = vpop.permute.xlu1 %102 }
  0xb1   :  { %v128_v44 = vpop.permute.xlu0 %127  ;;  %v106_v49 = vsel %vm104_vm7, %v103_v30, %v101_v26  ;;  %v105_v54 = vsel %vm104_vm7, %v101_v26, %v103_v30  ;;  %v122_v30 = vmul.f32 %v389_v21, %v366_v6 }
  0xb2   :  { %v107_v57 = vsel %vm402_vm1, %v106_v49, 0.0  ;;  %v108_v62 = vsel %vm431_vm9, %v105_v54, 0.0 }
  0xb3   :  { %v113_v2 = vmul.f32 %v387_v15, %v107_v57  ;;  %v114_v9 = vmul.f32 %v387_v15, %v108_v62 }
  0xb4   :  { %v414_v35 = vpop.permute.xlu1 %171 }
  0xb5   :  { %v143_v63 = vpop.permute.xlu0 %142  ;;  %v115_v14 = vadd.f32 %v113_v2, %v98_v8  ;;  %v116_v23 = vadd.f32 %v114_v9, %v99_v13 }
  0xb7   :  { %v123_v33 = vadd.f32 %v121_v22, %v115_v14  ;;  %v124_v39 = vadd.f32 %v122_v30, %v116_v23 }
  0xb8   :  { %v126_v45 = vpop.permute.xlu1 %125 }
  0xb9   :  { %v130_v3 = vsel %vm129_vm11, %v126_v45, %v128_v44  ;;  %v131_v10 = vsel %vm129_vm11, %v128_v44, %v126_v45  ;;  %v162_v19 = vpop.permute.xlu0 %161 }
  0xba   :  { %v132_v12 = vsel %vm409_vm4, %v130_v3, 0.0  ;;  %v133_v17 = vsel %vm437_vm10, %v131_v10, 0.0 }
  0xbb   :  { %v138_v24 = vmul.f32 %v393_v27, %v132_v12  ;;  %v139_v32 = vmul.f32 %v393_v27, %v133_v17 }
  0xbc   :  { %v191_v58 = vpop.permute.xlu1 %190 }
  0xbd   :  { %v140_v40 = vadd.f32 %v138_v24, %v123_v33  ;;  %v141_v42 = vadd.f32 %v139_v32, %v124_v39  ;;  %v200_v52 = vpop.permute.xlu0 %199 }
  0xc0   :  { %v145_v7 = vpop.permute.xlu1 %144 }
  0xc1   :  { %v147_v11 = vsel %vm146_vm12, %v143_v63, %v145_v7  ;;  %v148_v15 = vsel %vm146_vm12, %v145_v7, %v143_v63 }
  0xc2   :  { %v151_v18 = vsel %vm402_vm1, %v147_v11, 0.0  ;;  %v152_v28 = vsel %vm475_vm15, %v148_v15, 0.0  ;;  %vm186_vm1 = vmand %vm43_vm13, %vm437_vm10 }
  0xc3   :  { %v157_v36 = vmul.f32 %v400_v31, %v151_v18  ;;  %v158_v41 = vmul.f32 %v400_v31, %v152_v28 }
  0xc4   :  { %v164_v20 = vpop.permute.xlu1 %163 }
  0xc5   :  { %v167_v26 = vsel %vm165_vm14, %v164_v20, %v162_v19  ;;  %v166_v5 = vsel %vm165_vm14, %v162_v19, %v164_v20  ;;  %v159_v6 = vadd.f32 %v157_v36, %v140_v40  ;;  %v160_v44 = vadd.f32 %v158_v41, %v141_v42 }
  0xc6   :  { %v169_v37 = vsel %vm43_vm13, %v167_v26, 0.0  ;;  %v174_v21 = vmul.f32 %v414_v35, %v166_v5 }
  0xc7   :  { %v175_v27 = vmul.f32 %v414_v35, %v169_v37 }
  0xc8   :  { %v179_v38 = vpop.permute.xlu1 %178  ;;  %v176_v50 = vadd.f32 %v174_v21, %v159_v6 }
  0xc9   :  { %v177_v51 = vadd.f32 %v175_v27, %v160_v44 }
  0xcc   :  { %v181_v43 = vpop.permute.xlu1 %180 }
  0xcd   :  { %v183_v45 = vsel %vm182_vm0, %v179_v38, %v181_v43  ;;  %v184_v46 = vsel %vm182_vm0, %v181_v43, %v179_v38 }
  0xce   :  { %v187_v31 = vsel %vm409_vm4, %v183_v45, 0.0  ;;  %v188_v48 = vsel %vm186_vm1, %v184_v46, 0.0 }
  0xcf   :  { %v193_v25 = vmul.f32 %v191_v58, %v187_v31  ;;  %v194_v49 = vmul.f32 %v191_v58, %v188_v48 }
  0xd1   :  { %v195_v53 = vadd.f32 %v193_v25, %v176_v50  ;;  %v196_v35 = vadd.f32 %v194_v49, %v177_v51 }
  0xd3   :  { %v202_v54 = vadd.f32 %v200_v52, %v195_v53  ;;  %v203_v47 = vadd.f32 %v200_v52, %v196_v35 }
  0xd5   :  { %v204_v55 = vmul.f32 0.5, %v202_v54  ;;  %v205_v29 = vmul.f32 0.5, %v203_v47 }
  0xd7   :  { %258 = vtanh.f32 %v204_v55 }
  0xd8   :  { %260 = vtanh.f32 %v205_v29 }
  0xe1   :  { %v259_v56 = vpop.eup %258 }
  0xe2   :  { %v261_v57 = vpop.eup %260  ;;  %v208_v59 = vmul.f32 0.5, %v259_v56 }
  0xe3   :  { %v209_v34 = vmul.f32 0.5, %v261_v57 }
  0xe4   :  { %v210_v60 = vadd.f32 0.5, %v208_v59 }
  0xe5   :  { %v211_v61 = vadd.f32 0.5, %v209_v34 }
  0xe6   :  { %212 = vst [vmem:[#allocation5] sm:$0xff] %v210_v60 }
  0xe7   :  { %213 = vst [vmem:[#allocation5 + $0x8] sm:$0xff] %v211_v61 }
  0xe8   :  { %295 = shalt.err (!%p292_p12)
}
  0xe9   :  { %s296_s11 = scalar_lea.hbm %s525_s3, 256 }
  0xea   :  { %p297_p13 = scmp.ne.s32.totalorder %s525_s3, %s296_s11  ;;  %p300_p0 = scmp.lt.u32.totalorder %s296_s11, %s525_s3 }
  0xec   :  { %p302_p1 = pnand %p300_p0, %p297_p13 }
  0xee   :  { %305 = shalt.err (!%p302_p1)
}
  0xef   :  { %223 = dma.vmem_to_hbm [thread:$0]  %s221_s7, 256, %s525_s3, [#allocation4]  }
  0xf0   :  { %308 = dma.done.wait [#allocation4], 256  }
  0xf1   :  { %309 = vsyncadd [#allocation4], 4294967040 }
  0xf2   :  { %227 = vsyncpa [#allocation3], 1 }
  0xf3   :  { %228 = vsyncpa [#allocation4], 1 }

</bundles_post_ra>
